<compile_context>
chip_gen: v7x
topology: tpu7x:2x2x1
jax: 0.10.0
libtpu: 0.0.40
codegen_flags: <defaults>
</compile_context>

<pallas_src>
import functools

import jax
import jax.numpy as jnp
from jax.experimental import pallas as pl
from jax.experimental.pallas import tpu as pltpu


def _round_up(x, m):
    return ((x + m - 1) // m) * m


def _cdiv(a, b):
    return -(-a // b)


# ---------------------------------------------------------------------------
# Kernel
# ---------------------------------------------------------------------------
def actor_kernel(x_ref,
                 w1_ref, b1_ref,
                 w2_ref, b2_ref,
                 w3_ref, b3_ref,
                 wh_ref, bh_ref,
                 out_ref,
                 *, num_actions, compute_dtype):
    def dense(h, w_ref, b_ref):
        # Weights are already stored in compute_dtype (bf16 by default), so the
        # resident weight tile is never re-cast per grid step; only the
        # per-tile activations are cast. Accumulation is f32 on the MXU.
        return (jnp.dot(h.astype(compute_dtype), w_ref[...],
                        preferred_element_type=jnp.float32)
                + b_ref[...])

    # net: Linear -> Tanh (x3), all lane-dense 128-wide (zero-padded, exact)
    h = jnp.tanh(dense(x_ref[...], w1_ref, b1_ref))
    h = jnp.tanh(dense(h, w2_ref, b2_ref))
    h = jnp.tanh(dense(h, w3_ref, b3_ref))
    # TODO(synk): on v6e/v7x the tanh/exp chain could run bf16 on the EUP if a
    # bundle dump shows the EUP is the binding slot; kept f32 for accuracy
    # (v5e has no bf16 EUP/VPU anyway).

    # fused action + value head: one lane-dense (TB, head_dim) matmul
    head = dense(h, wh_ref, bh_ref)

    # (1, head_dim) column masks, broadcast inside the selects (no full-tile
    # iota / compares, lower vreg pressure).
    col = jax.lax.broadcasted_iota(jnp.int32, (1, head.shape[-1]), 1)
    is_action = col < num_actions          # columns [0, num_actions)  -> softmax
    is_value = col == num_actions          # column  num_actions       -> raw value

    # masked softmax over the action columns only; exp(-inf) = 0 in padded cols
    logits = jnp.where(is_action, head, -jnp.inf)
    m = jnp.max(logits, axis=-1, keepdims=True)
    e = jnp.exp(logits - m)
    s = jnp.sum(e, axis=-1, keepdims=True)
    probs = e / s                          # exact normalization (negligible cost)

    # probs is exactly 0 outside the action columns -> single select suffices
    out_ref[...] = (probs + jnp.where(is_value, head, 0.0)).astype(out_ref.dtype)


# ---------------------------------------------------------------------------
# Wrapper
# ---------------------------------------------------------------------------
def actor_forward(x, packed, *, num_actions, block_rows=4096,
                  compute_dtype=jnp.bfloat16):
    """x: (B, state_dim) f32; packed: padded/fused params from pack_actor_params."""
    B, state_dim = x.shape
    head_dim = packed["wh"].shape[1]       # num_actions + 1 padded up to 128

    # Batch tile: as large as block_rows allows (amortize ~0.35us/step), but
    # sized so large batches still produce >=4 grid steps (>=2 tiles per v7x
    # TensorCore, >=2 iterations each so the double-buffer overlaps DMA).
    TB = min(block_rows, _round_up(max(_cdiv(B, 4), 1), 8))
    B_pad = _round_up(B, TB)
    # TODO(synk): ragged last tile handled by a (small) zero-pad copy of x when
    # B % TB != 0; exact because padded rows are sliced off below.
    x_pad = jnp.pad(x, ((0, B_pad - B), (0, 0))) if B_pad != B else x
    grid = (B_pad // TB,)

    def row_spec(cols):
        return pl.BlockSpec((TB, cols), lambda i: (i, 0))

    def resident(arr):
        # Constant index_map -> weight/bias tiles stay resident in VMEM.
        return pl.BlockSpec(arr.shape, lambda i: (0, 0))

    args = (x_pad,
            packed["w1"], packed["b1"],
            packed["w2"], packed["b2"],
            packed["w3"], packed["b3"],
            packed["wh"], packed["bh"])
    in_specs = [row_spec(state_dim)] + [resident(a) for a in args[1:]]

    # advisory cost hint for XLA scheduling
    flops = 2 * B_pad * (state_dim * 128 + 128 * 128 + 128 * 128 + 128 * head_dim)
    transcendentals = B_pad * (3 * 128 + head_dim)        # tanh x3, exp
    weight_bytes = sum(int(a.size) * a.dtype.itemsize for a in args[1:])
    bytes_accessed = 4 * B_pad * (state_dim + head_dim) + weight_bytes

    out = pl.pallas_call(
        functools.partial(actor_kernel,
                          num_actions=num_actions,
                          compute_dtype=compute_dtype),
        out_shape=jax.ShapeDtypeStruct((B_pad, head_dim), jnp.float32),
        grid=grid,
        in_specs=in_specs,
        out_specs=row_spec(head_dim),
        compiler_params=pltpu.CompilerParams(
            dimension_semantics=("parallel",),          # v7x: shard tiles over 2 TCs
            vmem_limit_bytes=32 * 1024 * 1024),         # v7x-safe (64 MiB physical)
        cost_estimate=pl.CostEstimate(
            flops=flops,
            transcendentals=transcendentals,
            bytes_accessed=bytes_accessed),
    )(*args)

    probs = out[:B, :num_actions]
    value = out[:B, num_actions:num_actions + 1]
    return probs, value


# ---------------------------------------------------------------------------
# Parameters (mirror torch init_: orthogonal with tanh gain, zero bias)
# ---------------------------------------------------------------------------
def _orthogonal(key, shape, gain):
    return jax.nn.initializers.orthogonal(scale=gain)(key, shape, jnp.float32)


def make_actor_params(key, state_dim, num_actions):
    gain = 5.0 / 3.0  # torch.nn.init.calculate_gain('tanh')
    ks = jax.random.split(key, 5)
    return {
        "w1": _orthogonal(ks[0], (state_dim, 128), gain),
        "b1": jnp.zeros((1, 128), jnp.float32),
        "w2": _orthogonal(ks[1], (128, 64), gain),
        "b2": jnp.zeros((1, 64), jnp.float32),
        "w3": _orthogonal(ks[2], (64, 64), gain),
        "b3": jnp.zeros((1, 64), jnp.float32),
        "wa": _orthogonal(ks[3], (64, num_actions), gain),
        "ba": jnp.zeros((1, num_actions), jnp.float32),
        "wv": _orthogonal(ks[4], (64, 1), gain),
        "bv": jnp.zeros((1, 1), jnp.float32),
    }


def pack_actor_params(params, num_actions, weight_dtype=jnp.bfloat16):
    """Zero-pad hidden dims to 128, fuse action+value heads into one lane-dense
    (128, round_up(num_actions+1, 128)) weight, and cast weights ONCE to
    weight_dtype (bf16 -> native MXU rate, half the weight footprint).
    Biases stay f32 (added to the f32 accumulator)."""
    head_dim = _round_up(num_actions + 1, 128)
    f32 = jnp.float32

    w2 = jnp.zeros((128, 128), f32).at[:, :64].set(params["w2"])
    b2 = jnp.zeros((1, 128), f32).at[:, :64].set(params["b2"])
    w3 = jnp.zeros((128, 128), f32).at[:64, :64].set(params["w3"])
    b3 = jnp.zeros((1, 128), f32).at[:, :64].set(params["b3"])

    wh = jnp.zeros((128, head_dim), f32)
    wh = wh.at[:64, :num_actions].set(params["wa"])
    wh = wh.at[:64, num_actions:num_actions + 1].set(params["wv"])
    bh = jnp.zeros((1, head_dim), f32)
    bh = bh.at[:, :num_actions].set(params["ba"])
    bh = bh.at[:, num_actions:num_actions + 1].set(params["bv"])

    return {
        "w1": params["w1"].astype(weight_dtype), "b1": params["b1"],
        "w2": w2.astype(weight_dtype), "b2": b2,
        "w3": w3.astype(weight_dtype), "b3": b3,
        "wh": wh.astype(weight_dtype), "bh": bh,
    }


def reference_forward(x, params):
    h = jnp.tanh(x @ params["w1"] + params["b1"])
    h = jnp.tanh(h @ params["w2"] + params["b2"])
    h = jnp.tanh(h @ params["w3"] + params["b3"])
    probs = jax.nn.softmax(h @ params["wa"] + params["ba"], axis=-1)
    value = h @ params["wv"] + params["bv"]
    return probs, value


if __name__ == "__main__":
    key = jax.random.PRNGKey(0)
    k_param, k_x = jax.random.split(key)

    batch = 2
    state_dim = 32
    num_actions = 8

    params = make_actor_params(k_param, state_dim, num_actions)
    packed = pack_actor_params(params, num_actions)          # bf16 weights
    x = jax.random.normal(k_x, (batch, state_dim), jnp.float32)

    fwd = jax.jit(functools.partial(actor_forward, num_actions=num_actions))
    probs, value = jax.block_until_ready(fwd(x, packed))

    # correctness check against the pure-JAX f32 reference (kernel uses bf16
    # weights/activations with f32 accumulation -> relaxed tolerances)
    probs_ref, value_ref = reference_forward(x, params)
    assert probs.shape == (batch, num_actions)
    assert value.shape == (batch, 1)
    assert jnp.allclose(probs, probs_ref, atol=2e-2, rtol=2e-2)
    assert jnp.allclose(jnp.sum(probs, axis=-1), 1.0, atol=2e-3)   # exact divide
    assert jnp.allclose(value, value_ref, atol=5e-2, rtol=5e-2)

    print("KERNEL_OK")
</pallas_src>

<mosaic_0001>
module attributes {stable_mosaic.version = 11 : i64} {
  func.func @actor_kernel(%arg0: i32, %arg1: memref<8x32xf32, #tpu.memory_space<vmem>>, %arg2: memref<32x128xbf16, #tpu.memory_space<vmem>>, %arg3: memref<1x128xf32, #tpu.memory_space<vmem>>, %arg4: memref<128x128xbf16, #tpu.memory_space<vmem>>, %arg5: memref<1x128xf32, #tpu.memory_space<vmem>>, %arg6: memref<128x128xbf16, #tpu.memory_space<vmem>>, %arg7: memref<1x128xf32, #tpu.memory_space<vmem>>, %arg8: memref<128x128xbf16, #tpu.memory_space<vmem>>, %arg9: memref<1x128xf32, #tpu.memory_space<vmem>>, %arg10: memref<8x128xf32, #tpu.memory_space<vmem>>) attributes {dimension_semantics = [#tpu.dimension_semantics<parallel>], iteration_bounds = array<i64: 1>, scalar_prefetch = 0 : i64, scratch_operands = 0 : i64, tpu.core_type = #tpu.core_type<tc>, window_params = [{transform_indices = @transform_0, window_bounds = array<i64: 8, 32>}, {pipeline_mode = #tpu.pipeline_mode<synchronous>, transform_indices = @transform_1, window_bounds = array<i64: 32, 128>}, {pipeline_mode = #tpu.pipeline_mode<synchronous>, transform_indices = @transform_2, window_bounds = array<i64: 1, 128>}, {pipeline_mode = #tpu.pipeline_mode<synchronous>, transform_indices = @transform_3, window_bounds = array<i64: 128, 128>}, {pipeline_mode = #tpu.pipeline_mode<synchronous>, transform_indices = @transform_4, window_bounds = array<i64: 1, 128>}, {pipeline_mode = #tpu.pipeline_mode<synchronous>, transform_indices = @transform_5, window_bounds = array<i64: 128, 128>}, {pipeline_mode = #tpu.pipeline_mode<synchronous>, transform_indices = @transform_6, window_bounds = array<i64: 1, 128>}, {pipeline_mode = #tpu.pipeline_mode<synchronous>, transform_indices = @transform_7, window_bounds = array<i64: 128, 128>}, {pipeline_mode = #tpu.pipeline_mode<synchronous>, transform_indices = @transform_8, window_bounds = array<i64: 1, 128>}, {transform_indices = @transform_9, window_bounds = array<i64: 8, 128>}]} {
    %c0 = arith.constant 0 : index
    %c0_0 = arith.constant 0 : index
    %0 = vector.load %arg1[%c0, %c0_0] : memref<8x32xf32, #tpu.memory_space<vmem>>, vector<8x32xf32>
    %1 = arith.truncf %0 : vector<8x32xf32> to vector<8x32xbf16>
    %c0_1 = arith.constant 0 : index
    %c0_2 = arith.constant 0 : index
    %2 = vector.load %arg2[%c0_1, %c0_2] : memref<32x128xbf16, #tpu.memory_space<vmem>>, vector<32x128xbf16>
    %cst = arith.constant dense<0.000000e+00> : vector<8x128xf32>
    %3 = tpu.matmul %1, %2, %cst {dimension_numbers = #tpu.dot_dimension_numbers<[1], [0], [0], [1], [0, 0, 1, 1], [], []>} : vector<8x32xbf16>, vector<32x128xbf16>, vector<8x128xf32> -> vector<8x128xf32>
    %c0_3 = arith.constant 0 : index
    %c0_4 = arith.constant 0 : index
    %4 = vector.load %arg3[%c0_3, %c0_4] : memref<1x128xf32, #tpu.memory_space<vmem>>, vector<1x128xf32>
    %5 = vector.broadcast %4 : vector<1x128xf32> to vector<8x128xf32>
    %6 = arith.addf %3, %5 : vector<8x128xf32>
    %7 = math.tanh %6 : vector<8x128xf32>
    %8 = arith.truncf %7 : vector<8x128xf32> to vector<8x128xbf16>
    %c0_5 = arith.constant 0 : index
    %c0_6 = arith.constant 0 : index
    %9 = vector.load %arg4[%c0_5, %c0_6] : memref<128x128xbf16, #tpu.memory_space<vmem>>, vector<128x128xbf16>
    %cst_7 = arith.constant dense<0.000000e+00> : vector<8x128xf32>
    %10 = tpu.matmul %8, %9, %cst_7 {dimension_numbers = #tpu.dot_dimension_numbers<[1], [0], [0], [1], [0, 0, 1, 1], [], []>} : vector<8x128xbf16>, vector<128x128xbf16>, vector<8x128xf32> -> vector<8x128xf32>
    %c0_8 = arith.constant 0 : index
    %c0_9 = arith.constant 0 : index
    %11 = vector.load %arg5[%c0_8, %c0_9] : memref<1x128xf32, #tpu.memory_space<vmem>>, vector<1x128xf32>
    %12 = vector.broadcast %11 : vector<1x128xf32> to vector<8x128xf32>
    %13 = arith.addf %10, %12 : vector<8x128xf32>
    %14 = math.tanh %13 : vector<8x128xf32>
    %15 = arith.truncf %14 : vector<8x128xf32> to vector<8x128xbf16>
    %c0_10 = arith.constant 0 : index
    %c0_11 = arith.constant 0 : index
    %16 = vector.load %arg6[%c0_10, %c0_11] : memref<128x128xbf16, #tpu.memory_space<vmem>>, vector<128x128xbf16>
    %cst_12 = arith.constant dense<0.000000e+00> : vector<8x128xf32>
    %17 = tpu.matmul %15, %16, %cst_12 {dimension_numbers = #tpu.dot_dimension_numbers<[1], [0], [0], [1], [0, 0, 1, 1], [], []>} : vector<8x128xbf16>, vector<128x128xbf16>, vector<8x128xf32> -> vector<8x128xf32>
    %c0_13 = arith.constant 0 : index
    %c0_14 = arith.constant 0 : index
    %18 = vector.load %arg7[%c0_13, %c0_14] : memref<1x128xf32, #tpu.memory_space<vmem>>, vector<1x128xf32>
    %19 = vector.broadcast %18 : vector<1x128xf32> to vector<8x128xf32>
    %20 = arith.addf %17, %19 : vector<8x128xf32>
    %21 = math.tanh %20 : vector<8x128xf32>
    %22 = arith.truncf %21 : vector<8x128xf32> to vector<8x128xbf16>
    %c0_15 = arith.constant 0 : index
    %c0_16 = arith.constant 0 : index
    %23 = vector.load %arg8[%c0_15, %c0_16] : memref<128x128xbf16, #tpu.memory_space<vmem>>, vector<128x128xbf16>
    %cst_17 = arith.constant dense<0.000000e+00> : vector<8x128xf32>
    %24 = tpu.matmul %22, %23, %cst_17 {dimension_numbers = #tpu.dot_dimension_numbers<[1], [0], [0], [1], [0, 0, 1, 1], [], []>} : vector<8x128xbf16>, vector<128x128xbf16>, vector<8x128xf32> -> vector<8x128xf32>
    %c0_18 = arith.constant 0 : index
    %c0_19 = arith.constant 0 : index
    %25 = vector.load %arg9[%c0_18, %c0_19] : memref<1x128xf32, #tpu.memory_space<vmem>>, vector<1x128xf32>
    %26 = vector.broadcast %25 : vector<1x128xf32> to vector<8x128xf32>
    %27 = arith.addf %24, %26 : vector<8x128xf32>
    %28 = tpu.iota {dimensions = array<i32: 1>} : vector<1x128xi32>
    %c8_i32 = arith.constant 8 : i32
    %29 = vector.broadcast %c8_i32 : i32 to vector<1x128xi32>
    %30 = arith.cmpi slt, %28, %29 : vector<1x128xi32>
    %c8_i32_20 = arith.constant 8 : i32
    %31 = vector.broadcast %c8_i32_20 : i32 to vector<1x128xi32>
    %32 = arith.cmpi eq, %28, %31 : vector<1x128xi32>
    %cst_21 = arith.constant 0xFF800000 : f32
    %33 = vector.shape_cast %30 : vector<1x128xi1> to vector<1x128xi1>
    %34 = vector.broadcast %33 : vector<1x128xi1> to vector<8x128xi1>
    %35 = vector.broadcast %cst_21 : f32 to vector<8x128xf32>
    %36 = arith.select %34, %27, %35 : vector<8x128xi1>, vector<8x128xf32>
    %cst_22 = arith.constant dense<0xFF800000> : vector<8xf32>
    %37 = vector.multi_reduction <maximumf>, %36, %cst_22 [1] : vector<8x128xf32> to vector<8xf32>
    %38 = vector.shape_cast %37 : vector<8xf32> to vector<8x1xf32>
    %39 = vector.broadcast %38 : vector<8x1xf32> to vector<8x128xf32>
    %40 = arith.subf %36, %39 : vector<8x128xf32>
    %41 = math.exp %40 : vector<8x128xf32>
    %cst_23 = arith.constant dense<0.000000e+00> : vector<8xf32>
    %42 = vector.multi_reduction <add>, %41, %cst_23 [1] : vector<8x128xf32> to vector<8xf32>
    %43 = vector.shape_cast %42 : vector<8xf32> to vector<8x1xf32>
    %44 = vector.broadcast %43 : vector<8x1xf32> to vector<8x128xf32>
    %45 = arith.divf %41, %44 : vector<8x128xf32>
    %cst_24 = arith.constant 0.000000e+00 : f32
    %46 = vector.shape_cast %32 : vector<1x128xi1> to vector<1x128xi1>
    %47 = vector.broadcast %46 : vector<1x128xi1> to vector<8x128xi1>
    %48 = vector.broadcast %cst_24 : f32 to vector<8x128xf32>
    %49 = arith.select %47, %27, %48 : vector<8x128xi1>, vector<8x128xf32>
    %50 = arith.addf %45, %49 : vector<8x128xf32>
    %c0_25 = arith.constant 0 : index
    %c0_26 = arith.constant 0 : index
    %51 = vector.load %arg10[%c0_25, %c0_26] : memref<8x128xf32, #tpu.memory_space<vmem>>, vector<8x128xf32>
    tpu.vector_store %arg10[%c0_25, %c0_26], %50 {strides = array<i32>} : memref<8x128xf32, #tpu.memory_space<vmem>>, vector<8x128xf32>,
    return
  }
  func.func @transform_0(%arg0: i32) -> (i32, i32) {
    %c0_i32 = arith.constant 0 : i32
    %c0_i32_0 = arith.constant 0 : i32
    return %arg0, %c0_i32 : i32, i32
  }
  func.func @transform_1(%arg0: i32) -> (i32, i32) {
    %c0_i32 = arith.constant 0 : i32
    %c0_i32_0 = arith.constant 0 : i32
    %c0_i32_1 = arith.constant 0 : i32
    return %c0_i32, %c0_i32_0 : i32, i32
  }
  func.func @transform_2(%arg0: i32) -> (i32, i32) {
    %c0_i32 = arith.constant 0 : i32
    %c0_i32_0 = arith.constant 0 : i32
    %c0_i32_1 = arith.constant 0 : i32
    return %c0_i32, %c0_i32_0 : i32, i32
  }
  func.func @transform_3(%arg0: i32) -> (i32, i32) {
    %c0_i32 = arith.constant 0 : i32
    %c0_i32_0 = arith.constant 0 : i32
    %c0_i32_1 = arith.constant 0 : i32
    return %c0_i32, %c0_i32_0 : i32, i32
  }
  func.func @transform_4(%arg0: i32) -> (i32, i32) {
    %c0_i32 = arith.constant 0 : i32
    %c0_i32_0 = arith.constant 0 : i32
    %c0_i32_1 = arith.constant 0 : i32
    return %c0_i32, %c0_i32_0 : i32, i32
  }
  func.func @transform_5(%arg0: i32) -> (i32, i32) {
    %c0_i32 = arith.constant 0 : i32
    %c0_i32_0 = arith.constant 0 : i32
    %c0_i32_1 = arith.constant 0 : i32
    return %c0_i32, %c0_i32_0 : i32, i32
  }
  func.func @transform_6(%arg0: i32) -> (i32, i32) {
    %c0_i32 = arith.constant 0 : i32
    %c0_i32_0 = arith.constant 0 : i32
    %c0_i32_1 = arith.constant 0 : i32
    return %c0_i32, %c0_i32_0 : i32, i32
  }
  func.func @transform_7(%arg0: i32) -> (i32, i32) {
    %c0_i32 = arith.constant 0 : i32
    %c0_i32_0 = arith.constant 0 : i32
    %c0_i32_1 = arith.constant 0 : i32
    return %c0_i32, %c0_i32_0 : i32, i32
  }
  func.func @transform_8(%arg0: i32) -> (i32, i32) {
    %c0_i32 = arith.constant 0 : i32
    %c0_i32_0 = arith.constant 0 : i32
    %c0_i32_1 = arith.constant 0 : i32
    return %c0_i32, %c0_i32_0 : i32, i32
  }
  func.func @transform_9(%arg0: i32) -> (i32, i32) {
    %c0_i32 = arith.constant 0 : i32
    %c0_i32_0 = arith.constant 0 : i32
    return %arg0, %c0_i32 : i32, i32
  }
}

</mosaic_0001>

<bundles_post_ra>
// kernel: actor_forward.1
= control target key start
LH: loop header
LB: loop body
LE: loop exit
PB: predicated region body
PF: predicated region fallthrough
CT: control target
= control target key end

     0   :  { %14 = vsyncpa [#allocation3], 0  ;;  %s918_s0 = inlined_call_operand.vmem [shape: f32[8,32], index: 0, kind: input, shape index: {}]   ;;  %s919_s1 = inlined_call_operand.vmem [shape: bf16[32,128], index: 1, kind: input, shape index: {}]   ;;  %s920_s2 = inlined_call_operand.vmem [shape: f32[1,128], index: 2, kind: input, shape index: {}]   ;;  %s921_s3 = inlined_call_operand.hbm [shape: bf16[128,128], index: 3, kind: input, shape index: {}]   ;;  %s922_s4 = inlined_call_operand.vmem [shape: f32[1,128], index: 4, kind: input, shape index: {}]   ;;  %s923_s5 = inlined_call_operand.hbm [shape: bf16[128,128], index: 5, kind: input, shape index: {}]   ;;  %s924_s6 = inlined_call_operand.vmem [shape: f32[1,128], index: 6, kind: input, shape index: {}]   ;;  %s925_s7 = inlined_call_operand.hbm [shape: bf16[128,128], index: 7, kind: input, shape index: {}]   ;;  %s926_s8 = inlined_call_operand.vmem [shape: f32[1,128], index: 8, kind: input, shape index: {}]   ;;  %s927_s9 = inlined_call_operand.vmem [shape: f32[8,128], index: 9, kind: output, shape index: {}]  }
   0x1   :  { %15 = vsyncpa [#allocation5], 0  ;;  %s751_s30 = smov [#allocation4]   ;;  %s752_s11 = smov [#allocation2]  }
   0x2   :  { %s41_s10 = sshll.u32 %s751_s30, 4  ;;  %s27_s12 = sshll.u32 %s752_s11, 4  ;;  %s42_s10 = int_to_ptr.vmem [resolvable:$true] %s41_s10  ;;  %s808_s12 = int_to_ptr.vmem [resolvable:$true] %s27_s12 }
   0x3   :  { %s681_s15 = scalar_lea.hbm %s923_s5, 1024 }
   0x4   :  { %p682_p0 = scmp.ne.s32.totalorder %s923_s5, %s681_s15  ;;  %p685_p1 = scmp.lt.u32.totalorder %s681_s15, %s923_s5 }
   0x6   :  { %p687_p2 = pnand %p685_p1, %p682_p0 }
   0x8   :  { %690 = shalt.err (!%p687_p2)
}
   0x9   :  { %s691_s20 = scalar_lea.vmem %s42_s10, 1024  ;;  %p696_p4 = scmp.lt.s32.totalorder %s42_s10, %s42_s10 }
   0xa   :  { %p692_p3 = scmp.ne.s32.totalorder %s42_s10, %s691_s20  ;;  %p697_p5 = scmp.lt.s32.totalorder %s691_s20, %s691_s20 }
   0xc   :  { %p698_p6 = por %p697_p5, %p696_p4 }
   0xe   :  { %p699_p7 = pnand %p698_p6, %p692_p3 }
  0x10   :  { %702 = shalt.err (!%p699_p7)
}
  0x11   :  { %s753_s21 = smov 64   ;;  %s754_s22 = smov 4  }
  0x12   :  { %47 = dma.hbm_to_vmem [thread:$0]  %s923_s5, 1024, %s42_s10, [#allocation5], %s753_s21, %s753_s21, %s754_s22  }
  0x13   :  { %s703_s27 = scalar_lea.hbm %s921_s3, 1024 }
  0x14   :  { %p704_p8 = scmp.ne.s32.totalorder %s921_s3, %s703_s27  ;;  %p707_p9 = scmp.lt.u32.totalorder %s703_s27, %s921_s3 }
  0x16   :  { %p709_p10 = pnand %p707_p9, %p704_p8 }
  0x18   :  { %712 = shalt.err (!%p709_p10)
}
  0x19   :  { %s713_s13 = scalar_lea.vmem %s808_s12, 1024  ;;  %p718_p12 = scmp.lt.s32.totalorder %s808_s12, %s808_s12 }
  0x1a   :  { %p714_p11 = scmp.ne.s32.totalorder %s808_s12, %s713_s13  ;;  %p719_p13 = scmp.lt.s32.totalorder %s713_s13, %s713_s13 }
  0x1c   :  { %p720_p0 = por %p719_p13, %p718_p12 }
  0x1e   :  { %p721_p1 = pnand %p720_p0, %p714_p11 }
  0x20   :  { %724 = shalt.err (!%p721_p1)
}
  0x21   :  { %33 = dma.hbm_to_vmem [thread:$0]  %s921_s3, 1024, %s808_s12, [#allocation3], %s753_s21, %s753_s21, %s754_s22  }
  0x22   :  { %s755_s14 = smov [#allocation6]   ;;  %s725_s18 = scalar_lea.hbm %s925_s7, 1024 }
  0x23   :  { %s55_s15 = sshll.u32 %s755_s14, 4  ;;  %p726_p2 = scmp.ne.s32.totalorder %s925_s7, %s725_s18  ;;  %s56_s15 = int_to_ptr.vmem [resolvable:$true] %s55_s15 }
  0x24   :  { %p729_p3 = scmp.lt.u32.totalorder %s725_s18, %s925_s7 }
  0x26   :  { %p731_p4 = pnand %p729_p3, %p726_p2 }
  0x28   :  { %734 = shalt.err (!%p731_p4)
}
  0x29   :  { %s735_s25 = scalar_lea.vmem %s56_s15, 1024  ;;  %p740_p6 = scmp.lt.s32.totalorder %s56_s15, %s56_s15 }
  0x2a   :  { %p736_p5 = scmp.ne.s32.totalorder %s56_s15, %s735_s25  ;;  %p741_p7 = scmp.lt.s32.totalorder %s735_s25, %s735_s25 }
  0x2c   :  { %p742_p8 = por %p741_p7, %p740_p6 }
  0x2e   :  { %p743_p9 = pnand %p742_p8, %p736_p5 }
  0x30   :  { %746 = shalt.err (!%p743_p9)
}
  0x31   :  { %61 = dma.hbm_to_vmem [thread:$0]  %s925_s7, 1024, %s56_s15, [#allocation5], %s753_s21, %s753_s21, %s754_s22  }
  0x32   :  { %747 = dma.done.wait [#allocation3], 1024  }
  0x33   :  { %748 = vsyncadd [#allocation3], 4294966272 }
  0x34   :  { %749 = dma.done.wait [#allocation5], 2048  }
  0x35   :  { %750 = vsyncadd [#allocation5], 4294965248  ;;  %v756_v0 = vmov 0.0   ;;  %vm757_vm0 = vmmov 0   ;;  %v645_v1 = vld [vmem:[%s919_s1] sm:$0xff]   ;;  %v646_v2 = vld [vmem:[%s919_s1 + $0x8] sm:$0xff]   ;;  %v482_v53 = vlaneseq }
  0x36   :  { %570 = vmatprep.subr.bf16.mxu0 %v756_v0  ;;  %574 = vmatprep.mubr.msk.bf16.mxu0 %vm757_vm0, %v756_v0  ;;  %v74_v3 = vld [vmem:[%s918_s0] sm:$0xff]  ;;  %v647_v4 = vld [vmem:[#allocation2] sm:$0xff]   ;;  %v648_v6 = vld [vmem:[#allocation2 + $0x8] sm:$0xff]   ;;  %vm99_vm1 = vcmask 261120  }
  0x37   :  { %578 = vmatprep.subr.bf16.mxu1 %v756_v0  ;;  %594 = vmatprep.mubr.msk.bf16.mxu1 %vm757_vm0, %v756_v0  ;;  %v75_v5 = vpack.c.bf16 %v74_v3, %v74_v3  ;;  %v649_v7 = vld [vmem:[#allocation2 + $0x10] sm:$0xff]   ;;  %v650_v8 = vld [vmem:[#allocation2 + $0x18] sm:$0xff]   ;;  %v651_v9 = vld [vmem:[#allocation2 + $0x20] sm:$0xff]   ;;  %v483_v54 = vand.u32 127, %v482_v53 }
  0x38   :  { %571 = vmatpush3.bf16.msra.mxu0 %v645_v1  ;;  %579 = vmatpush3.bf16.msra.mxu1 %v647_v4  ;;  %v652_v10 = vld [vmem:[#allocation2 + $0x28] sm:$0xff]   ;;  %v653_v11 = vld [vmem:[#allocation2 + $0x30] sm:$0xff]   ;;  %v654_v12 = vld [vmem:[#allocation2 + $0x38] sm:$0xff]  }
  0x39   :  { %572 = vmatprep.subr.bf16.mxu0 %v756_v0  ;;  %580 = vmatprep.subr.bf16.mxu1 %v756_v0  ;;  %v655_v13 = vld [vmem:[#allocation4] sm:$0xff]   ;;  %v656_v14 = vld [vmem:[#allocation4 + $0x8] sm:$0xff]   ;;  %v657_v15 = vld [vmem:[#allocation4 + $0x10] sm:$0xff]   ;;  %vm485_vm2 = vcmp.eq.s32.totalorder %v483_v54, 8  ;;  %vm484_vm3 = vcmp.lt.s32.totalorder %v483_v54, 8 }
  0x3a   :  { %v658_v16 = vld [vmem:[#allocation4 + $0x18] sm:$0xff]   ;;  %v509_v17 = vld [vmem:[%s920_s2] ss:$0 sm:$0xff]  ;;  %v659_v25 = vld [vmem:[#allocation4 + $0x20] sm:$0xff]  }
  0x3b   :  { %v660_v26 = vld [vmem:[#allocation4 + $0x28] sm:$0xff]   ;;  %v661_v27 = vld [vmem:[#allocation4 + $0x30] sm:$0xff]   ;;  %v662_v28 = vld [vmem:[#allocation4 + $0x38] sm:$0xff]  }
  0x3c   :  { %573 = vmatpush3.bf16.msra.mxu0 %v646_v2  ;;  %581 = vmatpush3.bf16.msra.mxu1 %v648_v6  ;;  %v663_v29 = vld [vmem:[#allocation6] sm:$0xff]   ;;  %v664_v30 = vld [vmem:[#allocation6 + $0x8] sm:$0xff]   ;;  %v665_v31 = vld [vmem:[#allocation6 + $0x10] sm:$0xff]  }
  0x3d   :  { %598 = vmatprep.subr.bf16.mxu0 %v756_v0  ;;  %582 = vmatprep.subr.bf16.mxu1 %v756_v0  ;;  %v666_v32 = vld [vmem:[#allocation6 + $0x18] sm:$0xff]   ;;  %v513_v33 = vld [vmem:[%s922_s4] ss:$0 sm:$0xff]  ;;  %v667_v41 = vld [vmem:[#allocation6 + $0x20] sm:$0xff]  }
  0x3e   :  { %v668_v42 = vld [vmem:[#allocation6 + $0x28] sm:$0xff]   ;;  %v669_v43 = vld [vmem:[#allocation6 + $0x30] sm:$0xff]   ;;  %v670_v44 = vld [vmem:[#allocation6 + $0x38] sm:$0xff]  }
  0x3f   :  { %575 = vmatmul.mubr.msk.bf16.vlgmr.msra.gmra.mrb[0].mxu0 %vm99_vm1, %v75_v5  ;;  %v522_v45 = vld [vmem:[%s924_s6] ss:$0 sm:$0xff] }
  0x40   :  { %614 = vmatprep.mubr.msk.bf16.mxu0 %vm757_vm0, %v756_v0  ;;  %583 = vmatpush3.bf16.msra.mxu1 %v649_v7  ;;  %v531_v55 = vld [vmem:[%s926_s8] ss:$0 sm:$0xff] }
  0x41   :  { %584 = vmatprep.subr.bf16.mxu1 %v756_v0  ;;  %599 = vmatpush3.bf16.msra.mxu0 %v655_v13 }
  0x42   :  { %600 = vmatprep.subr.bf16.mxu0 %v756_v0 }
  0x44   :  { %585 = vmatpush3.bf16.msra.mxu1 %v650_v8 }
  0x45   :  { %586 = vmatprep.subr.bf16.mxu1 %v756_v0  ;;  %601 = vmatpush3.bf16.msra.mxu0 %v656_v14 }
  0x46   :  { %602 = vmatprep.subr.bf16.mxu0 %v756_v0 }
  0x48   :  { %587 = vmatpush3.bf16.msra.mxu1 %v651_v9 }
  0x49   :  { %588 = vmatprep.subr.bf16.mxu1 %v756_v0  ;;  %603 = vmatpush3.bf16.msra.mxu0 %v657_v15 }
  0x4a   :  { %604 = vmatprep.subr.bf16.mxu0 %v756_v0 }
  0x4c   :  { %589 = vmatpush3.bf16.msra.mxu1 %v652_v10 }
  0x4d   :  { %590 = vmatprep.subr.bf16.mxu1 %v756_v0  ;;  %605 = vmatpush3.bf16.msra.mxu0 %v658_v16 }
  0x4e   :  { %606 = vmatprep.subr.bf16.mxu0 %v756_v0 }
  0x50   :  { %591 = vmatpush3.bf16.msra.mxu1 %v653_v11 }
  0x51   :  { %592 = vmatprep.subr.bf16.mxu1 %v756_v0  ;;  %607 = vmatpush3.bf16.msra.mxu0 %v659_v25 }
  0x52   :  { %608 = vmatprep.subr.bf16.mxu0 %v756_v0 }
  0x54   :  { %593 = vmatpush3.bf16.msra.mxu1 %v654_v12 }
  0x55   :  { %618 = vmatprep.subr.bf16.mxu1 %v756_v0  ;;  %609 = vmatpush3.bf16.msra.mxu0 %v660_v26 }
  0x56   :  { %610 = vmatprep.subr.bf16.mxu0 %v756_v0 }
  0x59   :  { %611 = vmatpush3.bf16.msra.mxu0 %v661_v27 }
  0x5a   :  { %612 = vmatprep.subr.bf16.mxu0 %v756_v0 }
  0x5d   :  { %613 = vmatpush3.bf16.msra.mxu0 %v662_v28 }
 0x112   :  { %v137_v18 = vpop.f32.mrb[0].mxu0 }
 0x113   :  { %v138_v19 = vadd.f32 %v509_v17, %v137_v18  ;;  %v576_v20 = vpop.f32.mrb[1].mxu0 }
 0x114   :  { %v140_v21 = vpop.f32.mrb[2].mxu0 }
 0x115   :  { %671 = vtanh.f32 %v138_v19  ;;  %v577_v22 = vpop.f32.mrb[3].mxu0 }
 0x11f   :  { %v672_v23 = vpop.eup %671 }
 0x120   :  { %v144_v24 = vpack.c.bf16 %v672_v23, %v672_v23 }
 0x122   :  { %595 = vmatmul.mubr.bf16.vlgmr.msra.gmra.mrb[0].mxu1 %v144_v24 }
 0x123   :  { %634 = vmatprep.mubr.msk.bf16.mxu1 %vm757_vm0, %v756_v0  ;;  %619 = vmatpush3.bf16.msra.mxu1 %v663_v29 }
 0x124   :  { %620 = vmatprep.subr.bf16.mxu1 %v756_v0 }
 0x127   :  { %621 = vmatpush3.bf16.msra.mxu1 %v664_v30 }
 0x128   :  { %622 = vmatprep.subr.bf16.mxu1 %v756_v0 }
 0x12b   :  { %623 = vmatpush3.bf16.msra.mxu1 %v665_v31 }
 0x12c   :  { %624 = vmatprep.subr.bf16.mxu1 %v756_v0 }
 0x12f   :  { %625 = vmatpush3.bf16.msra.mxu1 %v666_v32 }
 0x130   :  { %626 = vmatprep.subr.bf16.mxu1 %v756_v0 }
 0x133   :  { %627 = vmatpush3.bf16.msra.mxu1 %v667_v41 }
 0x134   :  { %628 = vmatprep.subr.bf16.mxu1 %v756_v0 }
 0x137   :  { %629 = vmatpush3.bf16.msra.mxu1 %v668_v42 }
 0x138   :  { %630 = vmatprep.subr.bf16.mxu1 %v756_v0 }
 0x13b   :  { %631 = vmatpush3.bf16.msra.mxu1 %v669_v43 }
 0x13c   :  { %632 = vmatprep.subr.bf16.mxu1 %v756_v0 }
 0x13f   :  { %633 = vmatpush3.bf16.msra.mxu1 %v670_v44 }
 0x1f5   :  { %v250_v34 = vpop.f32.mrb[0].mxu1 }
 0x1f6   :  { %v251_v35 = vadd.f32 %v513_v33, %v250_v34  ;;  %v596_v36 = vpop.f32.mrb[1].mxu1 }
 0x1f7   :  { %v253_v37 = vpop.f32.mrb[2].mxu1 }
 0x1f8   :  { %673 = vtanh.f32 %v251_v35  ;;  %v597_v38 = vpop.f32.mrb[3].mxu1 }
 0x202   :  { %v674_v39 = vpop.eup %673 }
 0x203   :  { %v257_v40 = vpack.c.bf16 %v674_v39, %v674_v39 }
 0x205   :  { %615 = vmatmul.mubr.bf16.vlgmr.msra.gmra.mrb[4].mxu0 %v257_v40 }
 0x2d8   :  { %v363_v46 = vpop.f32.mrb[4].mxu0 }
 0x2d9   :  { %v364_v47 = vadd.f32 %v522_v45, %v363_v46  ;;  %v616_v48 = vpop.f32.mrb[5].mxu0 }
 0x2da   :  { %v366_v49 = vpop.f32.mrb[6].mxu0 }
 0x2db   :  { %675 = vtanh.f32 %v364_v47  ;;  %v617_v50 = vpop.f32.mrb[7].mxu0 }
 0x2e5   :  { %v676_v51 = vpop.eup %675 }
 0x2e6   :  { %v370_v52 = vpack.c.bf16 %v676_v51, %v676_v51 }
 0x2e8   :  { %635 = vmatmul.mubr.bf16.vlgmr.msra.gmra.mrb[4].mxu1 %v370_v52 }
 0x3bb   :  { %v476_v56 = vpop.f32.mrb[4].mxu1 }
 0x3bc   :  { %v477_v57 = vadd.f32 %v531_v55, %v476_v56  ;;  %v636_v58 = vpop.f32.mrb[5].mxu1 }
 0x3bd   :  { %v479_v59 = vpop.f32.mrb[6].mxu1 }
 0x3be   :  { %v500_v60 = vsel %vm485_vm2, %v477_v57, 0.0  ;;  %v637_v61 = vpop.f32.mrb[7].mxu1  ;;  %v488_v62 = vsel %vm484_vm3, %v477_v57, -inf }
 0x3bf   :  { %489 = vmax.xlane.f32.xlu0 %v488_v62 }
 0x44c   :  { %v490_v63 = vpop.xlane.xlu0 %489 }
 0x44d   :  { %v491_v0 = vsub.f32 %v488_v62, %v490_v63 }
 0x44f   :  { %v492_v1 = vmul.f32 1.442695, %v491_v0 }
 0x451   :  { %677 = vpow2.f32 %v492_v1 }
 0x45b   :  { %v678_v2 = vpop.eup %677 }
 0x45c   :  { %494 = vadd.xlane.f32.xlu0 %v678_v2 }
 0x4e9   :  { %v495_v3 = vpop.xlane.xlu0 %494 }
 0x4ea   :  { %679 = vrcp.f32 %v495_v3 }
 0x4f4   :  { %v680_v4 = vpop.eup %679 }
 0x4f5   :  { %v497_v5 = vmul.f32 %v680_v4, %v678_v2 }
 0x4f7   :  { %v501_v6 = vadd.f32 %v500_v60, %v497_v5 }
 0x4f9   :  { %502 = vst [vmem:[%s927_s9] sm:$0xff] %v501_v6 }
 0x4fa   :  { %507 = vsyncpa [#allocation3], 1 }
 0x4fb   :  { %508 = vsyncpa [#allocation5], 1 }

</bundles_post_ra>
